<compile_context>
chip_gen: v6e
topology: v6e:2x2x1
jax: 0.10.0
libtpu: 0.0.40
codegen_flags: <defaults>
</compile_context>

<pallas_src>
import jax
import jax.numpy as jnp
from jax.experimental import pallas as pl
from jax.experimental.pallas import tpu as pltpu


def upsample_kernel(x_ref, w_ref, b_ref, a_ref, o_ref):
    # x_ref: (tm, 3*(W+2)*Cin)        bf16 stacked-K input slab (VMEM)
    # w_ref: (3*(W+2)*Cin, C*r*W*r)   bf16 banded weights, shuffle-ordered cols (VMEM)
    # b_ref: (1, C*r*W*r)             f32 bias in shuffle column order (VMEM)
    # a_ref: (1,)                     f32 PReLU alpha scalar (SMEM)
    # o_ref: (tm, C*r*W*r)            f32 conv+bias+PReLU output, lane-dense (VMEM)
    acc = jnp.dot(x_ref[...], w_ref[...], preferred_element_type=jnp.float32)
    acc = acc + b_ref[...]                          # bias (broadcast over rows)
    alpha = a_ref[0]                                # scalar PReLU slope (SMEM)
    acc = jnp.where(acc >= 0.0, acc, acc * alpha)   # PReLU
    o_ref[...] = acc.astype(o_ref.dtype)            # unmasked lane-dense store


def _pick_tm(m):
    """Row-tile for the M = N*H grid axis (multiple of 8, divides M)."""
    if m <= 256 or m % 8 != 0:
        return m
    for tm in (512, 384, 256, 128, 64, 32, 16, 8):
        if m % tm == 0:
            return tm
    return m


def upsample_block(x_nchw, w_oihw, bias, alpha, up_scale):
    """Forward of UpsampleBLock. x_nchw: (N, Cin, H, W) -> (N, Cin, H*r, W*r)."""
    N, Cin, H, W = x_nchw.shape
    Cout = w_oihw.shape[0]
    r = up_scale
    C = Cout // (r * r)
    Wp = W + 2
    K = 3 * Wp * Cin            # contraction dim: kh, wp, cin folded together
    ncols = C * r * W * r       # == W*Cout, but in pixel-shuffle (c, rh, w, rw) order
    M = N * H

    # ---- glue: NCHW -> padded NHWC, stack the 3 kh-shifted slabs along K ----
    x_nhwc = jnp.transpose(x_nchw, (0, 2, 3, 1)).astype(jnp.float32)
    x_pad = jnp.pad(x_nhwc, ((0, 0), (1, 1), (1, 1), (0, 0)))      # (N, H+2, Wp, Cin)
    slabs = jnp.stack([x_pad[:, kh:kh + H] for kh in range(3)], axis=2)  # (N,H,3,Wp,Cin)
    lhs = slabs.reshape(M, K).astype(jnp.bfloat16)

    # ---- glue: banded weights (one-time), columns in pixel-shuffle order ----
    # w_stack[kh*Wp*Cin + wp*Cin + cin, col(c,rh,w,rw)] =
    #     w_hwio[kh, wp-w, cin, c*r*r + rh*r + rw]   if 0 <= wp-w < 3 else 0
    w_hwio = jnp.transpose(w_oihw, (2, 3, 1, 0)).astype(jnp.float32)  # (3,3,Cin,Cout)
    rows = jnp.arange(Wp * Cin)
    wp_i, cin_i = rows // Cin, rows % Cin
    cols = jnp.arange(ncols)
    rw_i = cols % r
    w_i = (cols // r) % W
    rh_i = (cols // (r * W)) % r
    c_i = cols // (r * W * r)
    co_i = c_i * r * r + rh_i * r + rw_i              # original conv out-channel
    kw_i = wp_i[:, None] - w_i[None, :]
    valid = (kw_i >= 0) & (kw_i < 3)
    vals = w_hwio[:, jnp.clip(kw_i, 0, 2), cin_i[:, None], co_i[None, :]]
    w_band = jnp.where(valid[None, :, :], vals, 0.0)  # (3, Wp*Cin, ncols)
    w_stack = w_band.reshape(K, ncols).astype(jnp.bfloat16)

    b2 = bias.astype(jnp.float32)[co_i].reshape(1, ncols)   # bias in shuffle order
    a1 = jnp.asarray(alpha, jnp.float32).reshape(1)

    tm = _pick_tm(M)
    grid = (M // tm,)

    # Actual dense MXU FLOPs of the banded form (not the logical conv count).
    flops = 2 * M * K * ncols
    bytes_accessed = 2 * (int(lhs.size) + int(w_stack.size)) + 4 * (int(b2.size) + M * ncols)

    y = pl.pallas_call(
        upsample_kernel,
        out_shape=jax.ShapeDtypeStruct((M, ncols), jnp.float32),
        grid=grid,
        in_specs=[
            pl.BlockSpec((tm, K), lambda i: (i, 0)),                 # stacked-K LHS
            pl.BlockSpec((K, ncols), lambda i: (0, 0)),              # banded RHS (resident)
            pl.BlockSpec((1, ncols), lambda i: (0, 0)),              # bias (resident)
            pl.BlockSpec(memory_space=pltpu.MemorySpace.SMEM),       # alpha scalar
        ],
        out_specs=pl.BlockSpec((tm, ncols), lambda i: (i, 0)),
        compiler_params=pltpu.CompilerParams(
            dimension_semantics=("parallel",)),
        cost_estimate=pl.CostEstimate(
            flops=flops, transcendentals=0, bytes_accessed=bytes_accessed),
    )(lhs, w_stack, b2, a1)

    # ---- glue: pixel shuffle is now just an H<->C swap (cols already (c,rh,w,rw)) ----
    y = y.reshape(N, H, C, r, W * r)
    y = jnp.transpose(y, (0, 2, 1, 3, 4))            # (N, C, H, r, W*r)
    y = y.reshape(N, C, H * r, W * r)
    return y.astype(x_nchw.dtype)


def reference(x_nchw, w_oihw, bias, alpha, up_scale):
    """Plain-JAX f32 reference matching PyTorch UpsampleBLock.forward."""
    r = up_scale
    y = jax.lax.conv_general_dilated(
        x_nchw, w_oihw, window_strides=(1, 1), padding=((1, 1), (1, 1)),
        dimension_numbers=("NCHW", "OIHW", "NCHW"))
    y = y + bias.reshape(1, -1, 1, 1)
    N, Cr2, H, W = y.shape
    C = Cr2 // (r * r)
    y = y.reshape(N, C, r, r, H, W)
    y = jnp.transpose(y, (0, 1, 4, 2, 5, 3)).reshape(N, C, H * r, W * r)
    return jnp.where(y >= 0, y, alpha * y)


if __name__ == "__main__":
    # Module config: in_channels=4, up_scale=2  ->  conv out channels = 4*2^2 = 16
    N, Cin, H, W = 2, 4, 16, 16
    up_scale = 2
    Cout = Cin * up_scale ** 2

    key = jax.random.PRNGKey(0)
    kx, kw, kb = jax.random.split(key, 3)
    x = jax.random.normal(kx, (N, Cin, H, W), jnp.float32)
    w = jax.random.normal(kw, (Cout, Cin, 3, 3), jnp.float32) * 0.1   # OIHW
    b = jax.random.normal(kb, (Cout,), jnp.float32) * 0.1
    alpha = jnp.array(0.25, jnp.float32)   # PyTorch PReLU default init

    out = jax.block_until_ready(upsample_block(x, w, b, alpha, up_scale))
    ref = jax.block_until_ready(reference(x, w, b, alpha, up_scale))

    assert out.shape == (N, Cin, H * up_scale, W * up_scale), out.shape
    # bf16 MXU operands with f32 accumulate: loosen tolerance vs f32 reference.
    assert jnp.allclose(out, ref, rtol=3e-2, atol=3e-2), \
        float(jnp.max(jnp.abs(out - ref)))
    print("KERNEL_OK")
</pallas_src>

<mosaic_0001>
module attributes {stable_mosaic.version = 11 : i64} {
  func.func @upsample_kernel(%arg0: i32, %arg1: memref<32x216xbf16, #tpu.memory_space<vmem>>, %arg2: memref<216x256xbf16, #tpu.memory_space<vmem>>, %arg3: memref<1x256xf32, #tpu.memory_space<vmem>>, %arg4: memref<1xf32, #tpu.memory_space<smem>>, %arg5: memref<32x256xf32, #tpu.memory_space<vmem>>) attributes {dimension_semantics = [#tpu.dimension_semantics<parallel>], iteration_bounds = array<i64: 1>, scalar_prefetch = 0 : i64, scratch_operands = 0 : i64, tpu.core_type = #tpu.core_type<tc>, window_params = [{transform_indices = @transform_0, window_bounds = array<i64: 32, 216>}, {pipeline_mode = #tpu.pipeline_mode<synchronous>, transform_indices = @transform_1, window_bounds = array<i64: 216, 256>}, {pipeline_mode = #tpu.pipeline_mode<synchronous>, transform_indices = @transform_2, window_bounds = array<i64: 1, 256>}, {transform_indices = @transform_3, window_bounds = array<i64: 1>}, {transform_indices = @transform_4, window_bounds = array<i64: 32, 256>}]} {
    %c0 = arith.constant 0 : index
    %c0_0 = arith.constant 0 : index
    %0 = vector.load %arg1[%c0, %c0_0] : memref<32x216xbf16, #tpu.memory_space<vmem>>, vector<32x216xbf16>
    %c0_1 = arith.constant 0 : index
    %c0_2 = arith.constant 0 : index
    %1 = vector.load %arg2[%c0_1, %c0_2] : memref<216x256xbf16, #tpu.memory_space<vmem>>, vector<216x256xbf16>
    %cst = arith.constant dense<0.000000e+00> : vector<32x256xf32>
    %2 = tpu.matmul %0, %1, %cst {dimension_numbers = #tpu.dot_dimension_numbers<[1], [0], [0], [1], [0, 0, 1, 1], [], []>} : vector<32x216xbf16>, vector<216x256xbf16>, vector<32x256xf32> -> vector<32x256xf32>
    %c0_3 = arith.constant 0 : index
    %c0_4 = arith.constant 0 : index
    %3 = vector.load %arg3[%c0_3, %c0_4] : memref<1x256xf32, #tpu.memory_space<vmem>>, vector<1x256xf32>
    %4 = vector.broadcast %3 : vector<1x256xf32> to vector<32x256xf32>
    %5 = arith.addf %2, %4 : vector<32x256xf32>
    %c0_5 = arith.constant 0 : index
    %6 = memref.load %arg4[%c0_5] : memref<1xf32, #tpu.memory_space<smem>>
    %cst_6 = arith.constant 0.000000e+00 : f32
    %7 = vector.broadcast %cst_6 : f32 to vector<32x256xf32>
    %8 = arith.cmpf oge, %5, %7 : vector<32x256xf32>
    %9 = vector.broadcast %6 : f32 to vector<32x256xf32>
    %10 = arith.mulf %5, %9 : vector<32x256xf32>
    %11 = arith.select %8, %5, %10 : vector<32x256xi1>, vector<32x256xf32>
    %c0_7 = arith.constant 0 : index
    %c0_8 = arith.constant 0 : index
    %12 = vector.load %arg5[%c0_7, %c0_8] : memref<32x256xf32, #tpu.memory_space<vmem>>, vector<32x256xf32>
    tpu.vector_store %arg5[%c0_7, %c0_8], %11 {strides = array<i32>} : memref<32x256xf32, #tpu.memory_space<vmem>>, vector<32x256xf32>,
    return
  }
  func.func @transform_0(%arg0: i32) -> (i32, i32) {
    %c0_i32 = arith.constant 0 : i32
    %c0_i32_0 = arith.constant 0 : i32
    return %arg0, %c0_i32 : i32, i32
  }
  func.func @transform_1(%arg0: i32) -> (i32, i32) {
    %c0_i32 = arith.constant 0 : i32
    %c0_i32_0 = arith.constant 0 : i32
    %c0_i32_1 = arith.constant 0 : i32
    return %c0_i32, %c0_i32_0 : i32, i32
  }
  func.func @transform_2(%arg0: i32) -> (i32, i32) {
    %c0_i32 = arith.constant 0 : i32
    %c0_i32_0 = arith.constant 0 : i32
    %c0_i32_1 = arith.constant 0 : i32
    return %c0_i32, %c0_i32_0 : i32, i32
  }
  func.func @transform_3(%arg0: i32) -> i32 {
    %c0_i32 = arith.constant 0 : i32
    %c0_i32_0 = arith.constant 0 : i32
    return %c0_i32 : i32
  }
  func.func @transform_4(%arg0: i32) -> (i32, i32) {
    %c0_i32 = arith.constant 0 : i32
    %c0_i32_0 = arith.constant 0 : i32
    return %arg0, %c0_i32 : i32, i32
  }
}

</mosaic_0001>

<bundles_post_ra>
// kernel: tpu_custom_call.1
= control target key start
LH: loop header
LB: loop body
LE: loop exit
PB: predicated region body
PF: predicated region fallthrough
CT: control target
= control target key end

     0   :  { %10 = vsyncpa [#allocation4], 0  ;;  %s593_s0 = inlined_call_operand.hbm [shape: bf16[32,216], index: 0, kind: input, shape index: {}]   ;;  %s594_s1 = inlined_call_operand.hbm [shape: bf16[216,256], index: 1, kind: input, shape index: {}]   ;;  %s595_s2 = inlined_call_operand.vmem [shape: f32[1,256], index: 2, kind: input, shape index: {}]   ;;  %s596_s3 = inlined_call_operand.<no memory space> [shape: f32[1], index: 3, kind: input, shape index: {}]   ;;  %s597_s4 = inlined_call_operand.hbm [shape: f32[32,256], index: 4, kind: output, shape index: {}]  }
   0x1   :  { %11 = vsyncpa [#allocation7], 0 }
   0x2   :  { %12 = vsyncpa [#allocation5], 0  ;;  %s546_s15 = smov [#allocation3]  }
   0x3   :  { %s18_s16 = sshll.u32 %s546_s15, 4  ;;  %s19_s16 = int_to_ptr.vmem [resolvable:$true] %s18_s16 }
   0x4   :  { %s488_s17 = scalar_lea.vmem %s19_s16, 512  ;;  %p493_p1 = scmp.lt.s32.totalorder %s19_s16, %s19_s16 }
   0x5   :  { %p489_p0 = scmp.ne.s32.totalorder %s19_s16, %s488_s17  ;;  %p494_p2 = scmp.lt.s32.totalorder %s488_s17, %s488_s17 }
   0x7   :  { %p495_p3 = por %p494_p2, %p493_p1 }
   0x9   :  { %p496_p4 = pnand %p495_p3, %p489_p0 }
   0xb   :  { %499 = shalt.err (!%p496_p4)
}
   0xc   :  { %s547_s18 = smov 128   ;;  %s548_s19 = smov 8  }
   0xd   :  { %24 = dma.hbm_to_vmem [thread:$0]  %s593_s0, 512, %s19_s16, [#allocation4], %s547_s18, %s547_s18, %s548_s19  }
   0xe   :  { %s549_s22 = smov [#allocation6]  }
   0xf   :  { %s30_s23 = sshll.u32 %s549_s22, 4  ;;  %s31_s23 = int_to_ptr.vmem [resolvable:$true] %s30_s23 }
  0x10   :  { %s508_s24 = scalar_lea.vmem %s31_s23, 3456  ;;  %p513_p6 = scmp.lt.s32.totalorder %s31_s23, %s31_s23 }
  0x11   :  { %p509_p5 = scmp.ne.s32.totalorder %s31_s23, %s508_s24  ;;  %p514_p7 = scmp.lt.s32.totalorder %s508_s24, %s508_s24 }
  0x13   :  { %p515_p8 = por %p514_p7, %p513_p6 }
  0x15   :  { %p516_p9 = pnand %p515_p8, %p509_p5 }
  0x17   :  { %519 = shalt.err (!%p516_p9)
}
  0x18   :  { %36 = dma.hbm_to_vmem [thread:$0]  %s594_s1, 3456, %s31_s23, [#allocation7], %s547_s18, %s547_s18, %s548_s19  }
  0x19   :  { %540 = dma.done.wait [#allocation4], 512  }
  0x1a   :  { %541 = vsyncadd [#allocation4], 4294966784 }
  0x1b   :  { %542 = dma.done.wait [#allocation7], 3456  }
  0x1c   :  { %543 = vsyncadd [#allocation7], 4294963840  ;;  %v433_v0 = vld [vmem:[#allocation6 + $0x74] ss:$8 sps:$4 sm:$0xff]   ;;  %v435_v1 = vld [vmem:[#allocation6 + $0x70] ss:$8 sps:$4 sm:$0xff]   ;;  %v81_v34 = vlaneseq  ;;  %v320_v41 = vstv %s596_s3 }
  0x1d   :  { %258 = vmatprep.subr.bf16.mxu0 %v433_v0  ;;  %398 = vmatprep.subr.bf16.mxu1 %v433_v0  ;;  %v436_v2 = vld [vmem:[#allocation6 + $0x64] ss:$8 sps:$4 sm:$0xff]   ;;  %v438_v3 = vld [vmem:[#allocation6 + $0x60] ss:$8 sps:$4 sm:$0xff]   ;;  %v439_v4 = vld [vmem:[#allocation6 + $0x54] ss:$8 sps:$4 sm:$0xff]  }
  0x1e   :  { %259 = vmatpush1.bf16.msra.mxu0 %v435_v1  ;;  %412 = vmatpush1.bf16.msra.mxu1 %v435_v1  ;;  %v441_v5 = vld [vmem:[#allocation6 + $0x50] ss:$8 sps:$4 sm:$0xff]   ;;  %v442_v6 = vld [vmem:[#allocation6 + $0x44] ss:$8 sps:$4 sm:$0xff]   ;;  %v444_v7 = vld [vmem:[#allocation6 + $0x40] ss:$8 sps:$4 sm:$0xff]  }
  0x1f   :  { %260 = vmatprep.subr.bf16.mxu0 %v436_v2  ;;  %399 = vmatprep.subr.bf16.mxu1 %v436_v2  ;;  %v445_v8 = vld [vmem:[#allocation6 + $0x34] ss:$8 sps:$4 sm:$0xff]   ;;  %v447_v9 = vld [vmem:[#allocation6 + $0x30] ss:$8 sps:$4 sm:$0xff]   ;;  %v448_v10 = vld [vmem:[#allocation6 + $0x24] ss:$8 sps:$4 sm:$0xff]  }
  0x20   :  { %v476_v11 = vld [vmem:[#allocation3 + $0x4] ss:$8 sps:$4 sm:$0xff]   ;;  %vm244_vm0 = vcmask 719872   ;;  %v450_v12 = vld [vmem:[#allocation6 + $0x20] ss:$8 sps:$4 sm:$0xff]   ;;  %v78_v17 = vld [vmem:[#allocation6 + $0xd0] sm:$0xff] }
  0x21   :  { %v451_v13 = vld [vmem:[#allocation6 + $0x14] ss:$8 sps:$4 sm:$0xff]   ;;  %396 = vmatprep.mubr.msk.bf16.mxu0 %vm244_vm0, %v476_v11  ;;  %v453_v15 = vld [vmem:[#allocation6 + $0x10] ss:$8 sps:$4 sm:$0xff]   ;;  %v454_v16 = vld [vmem:[#allocation6 + $0x4] ss:$8 sps:$4 sm:$0xff]   ;;  %v394_v19 = vcombine.high %v78_v17, %v78_v17  ;;  %v393_v20 = vcombine.low %v78_v17, %v78_v17 }
  0x22   :  { %261 = vmatpush1.bf16.msra.mxu0 %v438_v3  ;;  %413 = vmatpush1.bf16.msra.mxu1 %v438_v3  ;;  %v479_v14 = vld [vmem:[#allocation3 + $0x14] ss:$8 sps:$4 sm:$0xff]   ;;  %v456_v18 = vld [vmem:[#allocation6] ss:$8 sps:$4 sm:$0xff]   ;;  %vm251_vm1 = vcmask 1043456   ;;  %v82_v35 = vshrl.u32 %v81_v34, 7 }
  0x23   :  { %262 = vmatprep.subr.bf16.mxu0 %v439_v4  ;;  %400 = vmatprep.subr.bf16.mxu1 %v439_v4  ;;  %v253_v21 = vsel %vm251_vm1, %v393_v20, 0  ;;  %v459_v22 = vld [vmem:[#allocation6 + $0xc4] ss:$8 sps:$4 sm:$0xff]   ;;  %v461_v23 = vld [vmem:[#allocation6 + $0xc0] ss:$8 sps:$4 sm:$0xff]  }
  0x24   :  { %397 = vmatprep.mubr.msk.bf16.mxu1 %vm244_vm0, %v479_v14  ;;  %v462_v24 = vld [vmem:[#allocation6 + $0xb4] ss:$8 sps:$4 sm:$0xff]   ;;  %v464_v25 = vld [vmem:[#allocation6 + $0xb0] ss:$8 sps:$4 sm:$0xff]   ;;  %v465_v26 = vld [vmem:[#allocation6 + $0xa4] ss:$8 sps:$4 sm:$0xff]  }
  0x25   :  { %v467_v27 = vld [vmem:[#allocation6 + $0xa0] ss:$8 sps:$4 sm:$0xff]   ;;  %v468_v28 = vld [vmem:[#allocation6 + $0x94] ss:$8 sps:$4 sm:$0xff]   ;;  %v470_v29 = vld [vmem:[#allocation6 + $0x90] ss:$8 sps:$4 sm:$0xff]  }
  0x26   :  { %263 = vmatpush1.bf16.msra.mxu0 %v441_v5  ;;  %414 = vmatpush1.bf16.msra.mxu1 %v441_v5  ;;  %v471_v30 = vld [vmem:[#allocation6 + $0x84] ss:$8 sps:$4 sm:$0xff]   ;;  %v473_v31 = vld [vmem:[#allocation6 + $0x80] ss:$8 sps:$4 sm:$0xff]   ;;  %v477_v33 = vld [vmem:[#allocation3 + $0x10] ss:$8 sps:$4 sm:$0xff]  }
  0x27   :  { %264 = vmatprep.subr.bf16.mxu0 %v442_v6  ;;  %401 = vmatprep.subr.bf16.mxu1 %v442_v6  ;;  %v474_v32 = vld [vmem:[#allocation3] ss:$8 sps:$4 sm:$0xff]   ;;  %v83_v36 = vsub.s32 0, %v82_v35  ;;  %v87_v38 = vsub.s32 1, %v82_v35 }
  0x28   :  { %v79_v37 = vld [vmem:[%s595_s2] sm:$0x3]  ;;  %s550_s2 = smov [#allocation8]  }
  0x29   :  { %v84_v39 = vrot.slane %v79_v37, %v83_v36  ;;  %v88_v43 = vrot.slane %v79_v37, %v87_v38  ;;  %s350_s3 = sshll.u32 %s550_s2, 4  ;;  %s351_s3 = int_to_ptr.vmem [resolvable:$true] %s350_s3 }
  0x2a   :  { %265 = vmatpush1.bf16.msra.mxu0 %v444_v7  ;;  %415 = vmatpush1.bf16.msra.mxu1 %v444_v7  ;;  %s520_s29 = scalar_lea.vmem %s351_s3, 1024  ;;  %p525_p11 = scmp.lt.s32.totalorder %s351_s3, %s351_s3 }
  0x2b   :  { %266 = vmatprep.subr.bf16.mxu0 %v445_v8  ;;  %402 = vmatprep.subr.bf16.mxu1 %v445_v8  ;;  %p521_p10 = scmp.ne.s32.totalorder %s351_s3, %s520_s29  ;;  %p526_p12 = scmp.lt.s32.totalorder %s520_s29, %s520_s29 }
  0x2d   :  { %p527_p13 = por %p526_p12, %p525_p11 }
  0x2e   :  { %267 = vmatpush1.bf16.msra.mxu0 %v447_v9  ;;  %416 = vmatpush1.bf16.msra.mxu1 %v447_v9 }
  0x2f   :  { %268 = vmatprep.subr.bf16.mxu0 %v448_v10  ;;  %403 = vmatprep.subr.bf16.mxu1 %v448_v10  ;;  %p528_p0 = pnand %p527_p13, %p521_p10 }
  0x32   :  { %269 = vmatpush1.bf16.msra.mxu0 %v450_v12  ;;  %417 = vmatpush1.bf16.msra.mxu1 %v450_v12 }
  0x33   :  { %270 = vmatprep.subr.bf16.mxu0 %v451_v13  ;;  %404 = vmatprep.subr.bf16.mxu1 %v451_v13 }
  0x36   :  { %271 = vmatpush1.bf16.msra.mxu0 %v453_v15  ;;  %418 = vmatpush1.bf16.msra.mxu1 %v453_v15 }
  0x37   :  { %272 = vmatprep.subr.bf16.mxu0 %v454_v16  ;;  %405 = vmatprep.subr.bf16.mxu1 %v454_v16 }
  0x3a   :  { %273 = vmatpush1.bf16.msra.mxu0 %v456_v18  ;;  %419 = vmatpush1.bf16.msra.mxu1 %v456_v18 }
  0x3b   :  { %395 = vmatprep.subr.msk.bf16.mxu0 %vm251_vm1, %v394_v19  ;;  %406 = vmatprep.subr.msk.bf16.mxu1 %vm251_vm1, %v394_v19 }
  0x3e   :  { %279 = vmatpush2.bf16.msra.mxu0 %v253_v21  ;;  %420 = vmatpush2.bf16.msra.mxu1 %v253_v21 }
  0x3f   :  { %280 = vmatprep.subr.bf16.mxu0 %v459_v22  ;;  %407 = vmatprep.subr.bf16.mxu1 %v459_v22 }
  0x42   :  { %281 = vmatpush2.bf16.msra.mxu0 %v461_v23  ;;  %421 = vmatpush2.bf16.msra.mxu1 %v461_v23 }
  0x43   :  { %282 = vmatprep.subr.bf16.mxu0 %v462_v24  ;;  %408 = vmatprep.subr.bf16.mxu1 %v462_v24 }
  0x46   :  { %283 = vmatpush2.bf16.msra.mxu0 %v464_v25  ;;  %422 = vmatpush2.bf16.msra.mxu1 %v464_v25 }
  0x47   :  { %284 = vmatprep.subr.bf16.mxu0 %v465_v26  ;;  %409 = vmatprep.subr.bf16.mxu1 %v465_v26 }
  0x4a   :  { %285 = vmatpush2.bf16.msra.mxu0 %v467_v27  ;;  %423 = vmatpush2.bf16.msra.mxu1 %v467_v27 }
  0x4b   :  { %286 = vmatprep.subr.bf16.mxu0 %v468_v28  ;;  %410 = vmatprep.subr.bf16.mxu1 %v468_v28 }
  0x4e   :  { %287 = vmatpush2.bf16.msra.mxu0 %v470_v29  ;;  %424 = vmatpush2.bf16.msra.mxu1 %v470_v29 }
  0x4f   :  { %288 = vmatprep.subr.bf16.mxu0 %v471_v30  ;;  %411 = vmatprep.subr.bf16.mxu1 %v471_v30 }
  0x52   :  { %289 = vmatpush2.bf16.msra.mxu0 %v473_v31  ;;  %425 = vmatpush2.bf16.msra.mxu1 %v473_v31 }
  0x55   :  { %291 = vmatmul.mubr.bf16.vlgmr.msra.gmra.mxu0 %v474_v32  ;;  %301 = vmatmul.mubr.bf16.vlgmr.msra.gmra.mxu1 %v477_v33 }
 0x115   :  { %v292_v40 = vpop.f32.mrf.mxu0  ;;  %v302_v42 = vpop.f32.mrf.mxu1 }
 0x116   :  { %v293_v44 = vadd.f32 %v292_v40, %v84_v39  ;;  %v303_v45 = vadd.f32 %v302_v42, %v84_v39 }
 0x117   :  { %v294_v46 = vpop.f32.mrf.mxu0  ;;  %v304_v47 = vpop.f32.mrf.mxu1 }
 0x118   :  { %vm312_vm2 = vcmp.ge.f32.partialorder %v293_v44, 0.0  ;;  %v321_v48 = vmul.f32 %v320_v41, %v293_v44  ;;  %vm316_vm3 = vcmp.ge.f32.partialorder %v303_v45, 0.0  ;;  %v325_v49 = vmul.f32 %v320_v41, %v303_v45 }
 0x119   :  { %v295_v50 = vadd.f32 %v294_v46, %v88_v43  ;;  %v305_v51 = vadd.f32 %v304_v47, %v88_v43  ;;  %v296_v52 = vpop.f32.mrf.mxu0  ;;  %v306_v53 = vpop.f32.mrf.mxu1 }
 0x11a   :  { %v329_v54 = vsel %vm312_vm2, %v293_v44, %v321_v48  ;;  %v333_v55 = vsel %vm316_vm3, %v303_v45, %v325_v49  ;;  %v297_v56 = vadd.f32 %v296_v52, %v84_v39  ;;  %v307_v57 = vadd.f32 %v306_v53, %v84_v39 }
 0x11b   :  { %337 = vst [vmem:[#allocation8] sm:$0xff] %v329_v54  ;;  %341 = vst [vmem:[#allocation8 + $0x20] sm:$0xff] %v333_v55  ;;  %vm313_vm4 = vcmp.ge.f32.partialorder %v295_v50, 0.0  ;;  %v322_v58 = vmul.f32 %v320_v41, %v295_v50  ;;  %vm317_vm5 = vcmp.ge.f32.partialorder %v305_v51, 0.0  ;;  %v326_v59 = vmul.f32 %v320_v41, %v305_v51  ;;  %v298_v60 = vpop.f32.mrf.mxu0  ;;  %v308_v61 = vpop.f32.mrf.mxu1 }
 0x11c   :  { %vm314_vm6 = vcmp.ge.f32.partialorder %v297_v56, 0.0  ;;  %v323_v62 = vmul.f32 %v320_v41, %v297_v56  ;;  %vm318_vm7 = vcmp.ge.f32.partialorder %v307_v57, 0.0  ;;  %v327_v63 = vmul.f32 %v320_v41, %v307_v57 }
 0x11d   :  { %v330_v0 = vsel %vm313_vm4, %v295_v50, %v322_v58  ;;  %v334_v1 = vsel %vm317_vm5, %v305_v51, %v326_v59  ;;  %v299_v2 = vadd.f32 %v298_v60, %v88_v43  ;;  %v309_v3 = vadd.f32 %v308_v61, %v88_v43 }
 0x11e   :  { %338 = vst [vmem:[#allocation8 + $0x8] sm:$0xff] %v330_v0  ;;  %342 = vst [vmem:[#allocation8 + $0x28] sm:$0xff] %v334_v1  ;;  %v331_v4 = vsel %vm314_vm6, %v297_v56, %v323_v62  ;;  %v335_v5 = vsel %vm318_vm7, %v307_v57, %v327_v63 }
 0x11f   :  { %339 = vst [vmem:[#allocation8 + $0x10] sm:$0xff] %v331_v4  ;;  %343 = vst [vmem:[#allocation8 + $0x30] sm:$0xff] %v335_v5  ;;  %vm315_vm8 = vcmp.ge.f32.partialorder %v299_v2, 0.0  ;;  %v324_v6 = vmul.f32 %v320_v41, %v299_v2  ;;  %vm319_vm9 = vcmp.ge.f32.partialorder %v309_v3, 0.0  ;;  %v328_v7 = vmul.f32 %v320_v41, %v309_v3 }
 0x121   :  { %v332_v8 = vsel %vm315_vm8, %v299_v2, %v324_v6  ;;  %v336_v9 = vsel %vm319_vm9, %v309_v3, %v328_v7 }
 0x122   :  { %340 = vst [vmem:[#allocation8 + $0x18] sm:$0xff] %v332_v8  ;;  %344 = vst [vmem:[#allocation8 + $0x38] sm:$0xff] %v336_v9 }
 0x123   :  { %531 = shalt.err (!%p528_p0)
}
 0x124   :  { %s551_s30 = smov 256   ;;  %s552_s5 = smov 16  }
 0x125   :  { %356 = dma.vmem_to_hbm [thread:$0]  %s351_s3, 1024, %s597_s4, [#allocation5], %s551_s30, %s551_s30, %s552_s5  }
 0x126   :  { %544 = dma.done.wait [#allocation5], 1024  }
 0x127   :  { %545 = vsyncadd [#allocation5], 4294966272 }
 0x128   :  { %360 = vsyncpa [#allocation4], 1 }
 0x129   :  { %361 = vsyncpa [#allocation7], 1 }
 0x12a   :  { %362 = vsyncpa [#allocation5], 1 }

</bundles_post_ra>
